<compile_context>
chip_gen: v5e
topology: v5e:2x2
jax: 0.10.0
libtpu: 0.0.40
codegen_flags: <defaults>
</compile_context>

<pallas_src>
import jax
import jax.numpy as jnp
from jax.experimental import pallas as pl
from jax.experimental.pallas import tpu as pltpu


C_IN_PER_BRANCH = 16
C_IN_TOTAL = 4 * C_IN_PER_BRANCH          # 64
TILE_P_TARGET = 32768                     # pixels (lanes) per grid step
TARGET_STEP_BYTES = 8 << 20               # ~8 MiB of input per grid step
VMEM_LIMIT_BYTES = 28 << 20               # explicit budget (covers v5e..v7x)


def _round_up(x, m):
    return (x + m - 1) // m * m


def _cdiv(a, b):
    return -(-a // b)


def _choose_tiles(n, hw):
    """Pick (bn, tile_p): batch elements and pixels per grid step."""
    bytes_per_pixel = 4 * C_IN_PER_BRANCH * 4          # 4 branches * 16ch * f32
    if hw >= TILE_P_TARGET:
        tile_p = TILE_P_TARGET                          # multiple of 128
        bn = 1
    else:
        tile_p = hw                                     # full spatial dim (any alignment ok)
        bn = max(1, min(n, TARGET_STEP_BYTES // max(1, bytes_per_pixel * hw)))

    # Make sure both v7x TensorCores get work whenever the problem allows it.
    steps = _cdiv(n, bn) * _cdiv(hw, tile_p)
    if steps < 2:
        if bn > 1:
            bn = _cdiv(bn, 2)
        elif tile_p > 128:
            tile_p = _round_up(_cdiv(tile_p, 2), 128)
    return bn, tile_p


def _fuse_kernel(x1_ref, x2_ref, x3_ref, x4_ref, w_ref, b_ref, o_ref):
    # x*_ref: (BN, 16, TILE_P) VMEM      w_ref: (64, 1) VMEM
    # b_ref : (1,) SMEM scalar           o_ref: (BN, 1, TILE_P) VMEM (lane-dense)
    w = w_ref[...]                                       # (64, 1), fetched once
    # (16, 1) weight slices broadcast against (BN, 16, TILE_P) on the VPU.
    acc = x1_ref[...] * w[0:16]
    acc = acc + x2_ref[...] * w[16:32]
    acc = acc + x3_ref[...] * w[32:48]
    acc = acc + x4_ref[...] * w[48:64]                   # (BN, 16, TILE_P)
    out = jnp.sum(acc, axis=1, keepdims=True)            # (BN, 1, TILE_P), XLU reduce
    o_ref[...] = (out + b_ref[0]).astype(o_ref.dtype)


@jax.jit
def concat_fuse_block(x1, x2, x3, x4, weight, bias):
    """x1..x4: (N, 16, H, W) float32 NCHW.  weight: (1, 64, 1, 1).  bias: (1,).

    Returns (N, 1, H, W) float32, matching the PyTorch module.
    """
    n, c, h, w = x1.shape
    assert c == C_IN_PER_BRANCH
    hw = h * w

    # Free views: merge the two contiguous spatial dims, keep NCHW order.
    xs = [x.reshape(n, C_IN_PER_BRANCH, hw) for x in (x1, x2, x3, x4)]

    bn, tile_p = _choose_tiles(n, hw)
    grid = (pl.cdiv(n, bn), pl.cdiv(hw, tile_p))

    # 1x1 conv weight (1, 64, 1, 1) -> (64, 1) column; bias -> SMEM scalar.
    w_col = weight.reshape(1, C_IN_TOTAL).T.astype(jnp.float32)    # (64, 1)
    b_vec = bias.reshape(1).astype(jnp.float32)                    # (1,)

    x_spec = pl.BlockSpec(
        (bn, C_IN_PER_BRANCH, tile_p), lambda ni, pi: (ni, 0, pi))

    cost = pl.CostEstimate(
        flops=2 * C_IN_TOTAL * n * hw,
        transcendentals=0,
        bytes_accessed=4 * n * C_IN_PER_BRANCH * hw * 4    # inputs
        + n * hw * 4                                       # output
        + C_IN_TOTAL * 4 + 4,                              # weight + bias
    )

    out = pl.pallas_call(
        _fuse_kernel,
        out_shape=jax.ShapeDtypeStruct((n, 1, hw), x1.dtype),
        grid_spec=pltpu.PrefetchScalarGridSpec(
            num_scalar_prefetch=0,
            grid=grid,
            in_specs=[
                x_spec, x_spec, x_spec, x_spec,
                pl.BlockSpec((C_IN_TOTAL, 1), lambda ni, pi: (0, 0)),   # weight
                pl.BlockSpec(memory_space=pltpu.MemorySpace.SMEM),      # bias scalar
            ],
            out_specs=pl.BlockSpec(
                (bn, 1, tile_p), lambda ni, pi: (ni, 0, pi)),
        ),
        compiler_params=pltpu.CompilerParams(
            dimension_semantics=("parallel", "parallel"),
            vmem_limit_bytes=VMEM_LIMIT_BYTES),
        cost_estimate=cost,
    )(xs[0], xs[1], xs[2], xs[3], w_col, b_vec)

    return out.reshape(n, 1, h, w)


def _init_params(key):
    """Deterministic kaiming-uniform-style init for the 1x1 conv (64 -> 1)."""
    k_w, k_b = jax.random.split(key)
    fan_in = C_IN_TOTAL  # 64 (kernel is 1x1)
    w_bound = jnp.sqrt(6.0 / (2.0 * fan_in))   # kaiming_uniform_(a=1)
    weight = jax.random.uniform(
        k_w, (1, C_IN_TOTAL, 1, 1), jnp.float32, -w_bound, w_bound)
    b_bound = 1.0 / jnp.sqrt(fan_in)
    bias = jax.random.uniform(k_b, (1,), jnp.float32, -b_bound, b_bound)
    return weight, bias


if __name__ == "__main__":
    key = jax.random.PRNGKey(0)
    k1, k2, k3, k4, kp = jax.random.split(key, 5)

    N, H, W = 2, 16, 16
    x1 = jax.random.normal(k1, (N, C_IN_PER_BRANCH, H, W), jnp.float32)
    x2 = jax.random.normal(k2, (N, C_IN_PER_BRANCH, H, W), jnp.float32)
    x3 = jax.random.normal(k3, (N, C_IN_PER_BRANCH, H, W), jnp.float32)
    x4 = jax.random.normal(k4, (N, C_IN_PER_BRANCH, H, W), jnp.float32)

    weight, bias = _init_params(kp)

    out = concat_fuse_block(x1, x2, x3, x4, weight, bias)
    out = jax.block_until_ready(out)

    # Pure-JAX reference: concat on channel dim + 1x1 conv + bias.
    x_cat = jnp.concatenate([x1, x2, x3, x4], axis=1)              # (N, 64, H, W)
    ref = jnp.einsum("nchw,oc->nohw", x_cat, weight.reshape(1, C_IN_TOTAL))
    ref = ref + bias.reshape(1, 1, 1, 1)

    assert out.shape == (N, 1, H, W), out.shape
    assert jnp.allclose(out, ref, atol=1e-5, rtol=1e-5)
    print("KERNEL_OK")
</pallas_src>

<mosaic_0001>
module attributes {stable_mosaic.version = 11 : i64} {
  func.func @_fuse_kernel(%arg0: i32, %arg1: i32, %arg2: memref<1x16x256xf32, #tpu.memory_space<vmem>>, %arg3: memref<1x16x256xf32, #tpu.memory_space<vmem>>, %arg4: memref<1x16x256xf32, #tpu.memory_space<vmem>>, %arg5: memref<1x16x256xf32, #tpu.memory_space<vmem>>, %arg6: memref<64x1xf32, #tpu.memory_space<vmem>>, %arg7: memref<1xf32, #tpu.memory_space<smem>>, %arg8: memref<1x1x256xf32, #tpu.memory_space<vmem>>) attributes {dimension_semantics = [#tpu.dimension_semantics<parallel>, #tpu.dimension_semantics<parallel>], iteration_bounds = array<i64: 2, 1>, scalar_prefetch = 0 : i64, scratch_operands = 0 : i64, tpu.core_type = #tpu.core_type<tc>, window_params = [{transform_indices = @transform_0, window_bounds = array<i64: 1, 16, 256>}, {transform_indices = @transform_1, window_bounds = array<i64: 1, 16, 256>}, {transform_indices = @transform_2, window_bounds = array<i64: 1, 16, 256>}, {transform_indices = @transform_3, window_bounds = array<i64: 1, 16, 256>}, {pipeline_mode = #tpu.pipeline_mode<synchronous>, transform_indices = @transform_4, window_bounds = array<i64: 64, 1>}, {transform_indices = @transform_5, window_bounds = array<i64: 1>}, {transform_indices = @transform_6, window_bounds = array<i64: 1, 1, 256>}]} {
    %c0 = arith.constant 0 : index
    %c0_0 = arith.constant 0 : index
    %0 = vector.load %arg6[%c0, %c0_0] : memref<64x1xf32, #tpu.memory_space<vmem>>, vector<64x1xf32>
    %c0_1 = arith.constant 0 : index
    %c0_2 = arith.constant 0 : index
    %c0_3 = arith.constant 0 : index
    %1 = vector.load %arg2[%c0_1, %c0_2, %c0_3] : memref<1x16x256xf32, #tpu.memory_space<vmem>>, vector<1x16x256xf32>
    %2 = vector.extract_strided_slice %0 {offsets = [0, 0], sizes = [16, 1], strides = [1, 1]} : vector<64x1xf32> to vector<16x1xf32>
    %3 = vector.shape_cast %2 : vector<16x1xf32> to vector<1x16x1xf32>
    %4 = vector.broadcast %3 : vector<1x16x1xf32> to vector<1x16x256xf32>
    %5 = arith.mulf %1, %4 : vector<1x16x256xf32>
    %c0_4 = arith.constant 0 : index
    %c0_5 = arith.constant 0 : index
    %c0_6 = arith.constant 0 : index
    %6 = vector.load %arg3[%c0_4, %c0_5, %c0_6] : memref<1x16x256xf32, #tpu.memory_space<vmem>>, vector<1x16x256xf32>
    %7 = vector.extract_strided_slice %0 {offsets = [16, 0], sizes = [16, 1], strides = [1, 1]} : vector<64x1xf32> to vector<16x1xf32>
    %8 = vector.shape_cast %7 : vector<16x1xf32> to vector<1x16x1xf32>
    %9 = vector.broadcast %8 : vector<1x16x1xf32> to vector<1x16x256xf32>
    %10 = arith.mulf %6, %9 : vector<1x16x256xf32>
    %11 = arith.addf %5, %10 : vector<1x16x256xf32>
    %c0_7 = arith.constant 0 : index
    %c0_8 = arith.constant 0 : index
    %c0_9 = arith.constant 0 : index
    %12 = vector.load %arg4[%c0_7, %c0_8, %c0_9] : memref<1x16x256xf32, #tpu.memory_space<vmem>>, vector<1x16x256xf32>
    %13 = vector.extract_strided_slice %0 {offsets = [32, 0], sizes = [16, 1], strides = [1, 1]} : vector<64x1xf32> to vector<16x1xf32>
    %14 = vector.shape_cast %13 : vector<16x1xf32> to vector<1x16x1xf32>
    %15 = vector.broadcast %14 : vector<1x16x1xf32> to vector<1x16x256xf32>
    %16 = arith.mulf %12, %15 : vector<1x16x256xf32>
    %17 = arith.addf %11, %16 : vector<1x16x256xf32>
    %c0_10 = arith.constant 0 : index
    %c0_11 = arith.constant 0 : index
    %c0_12 = arith.constant 0 : index
    %18 = vector.load %arg5[%c0_10, %c0_11, %c0_12] : memref<1x16x256xf32, #tpu.memory_space<vmem>>, vector<1x16x256xf32>
    %19 = vector.extract_strided_slice %0 {offsets = [48, 0], sizes = [16, 1], strides = [1, 1]} : vector<64x1xf32> to vector<16x1xf32>
    %20 = vector.shape_cast %19 : vector<16x1xf32> to vector<1x16x1xf32>
    %21 = vector.broadcast %20 : vector<1x16x1xf32> to vector<1x16x256xf32>
    %22 = arith.mulf %18, %21 : vector<1x16x256xf32>
    %23 = arith.addf %17, %22 : vector<1x16x256xf32>
    %cst = arith.constant dense<0.000000e+00> : vector<1x256xf32>
    %24 = vector.multi_reduction <add>, %23, %cst [1] : vector<1x16x256xf32> to vector<1x256xf32>
    %25 = vector.shape_cast %24 : vector<1x256xf32> to vector<1x1x256xf32>
    %c0_13 = arith.constant 0 : index
    %26 = memref.load %arg7[%c0_13] : memref<1xf32, #tpu.memory_space<smem>>
    %27 = vector.broadcast %26 : f32 to vector<1x1x256xf32>
    %28 = arith.addf %25, %27 : vector<1x1x256xf32>
    %c0_14 = arith.constant 0 : index
    %c0_15 = arith.constant 0 : index
    %c0_16 = arith.constant 0 : index
    %29 = vector.load %arg8[%c0_14, %c0_15, %c0_16] : memref<1x1x256xf32, #tpu.memory_space<vmem>>, vector<1x1x256xf32>
    tpu.vector_store %arg8[%c0_14, %c0_15, %c0_16], %28 {strides = array<i32>} : memref<1x1x256xf32, #tpu.memory_space<vmem>>, vector<1x1x256xf32>,
    return
  }
  func.func @transform_0(%arg0: i32, %arg1: i32) -> (i32, i32, i32) {
    %c0_i32 = arith.constant 0 : i32
    %c0_i32_0 = arith.constant 0 : i32
    return %arg0, %c0_i32, %arg1 : i32, i32, i32
  }
  func.func @transform_1(%arg0: i32, %arg1: i32) -> (i32, i32, i32) {
    %c0_i32 = arith.constant 0 : i32
    %c0_i32_0 = arith.constant 0 : i32
    return %arg0, %c0_i32, %arg1 : i32, i32, i32
  }
  func.func @transform_2(%arg0: i32, %arg1: i32) -> (i32, i32, i32) {
    %c0_i32 = arith.constant 0 : i32
    %c0_i32_0 = arith.constant 0 : i32
    return %arg0, %c0_i32, %arg1 : i32, i32, i32
  }
  func.func @transform_3(%arg0: i32, %arg1: i32) -> (i32, i32, i32) {
    %c0_i32 = arith.constant 0 : i32
    %c0_i32_0 = arith.constant 0 : i32
    return %arg0, %c0_i32, %arg1 : i32, i32, i32
  }
  func.func @transform_4(%arg0: i32, %arg1: i32) -> (i32, i32) {
    %c0_i32 = arith.constant 0 : i32
    %c0_i32_0 = arith.constant 0 : i32
    %c0_i32_1 = arith.constant 0 : i32
    return %c0_i32, %c0_i32_0 : i32, i32
  }
  func.func @transform_5(%arg0: i32, %arg1: i32) -> i32 {
    %c0_i32 = arith.constant 0 : i32
    %c0_i32_0 = arith.constant 0 : i32
    return %c0_i32 : i32
  }
  func.func @transform_6(%arg0: i32, %arg1: i32) -> (i32, i32, i32) {
    %c0_i32 = arith.constant 0 : i32
    %c0_i32_0 = arith.constant 0 : i32
    return %arg0, %c0_i32, %arg1 : i32, i32, i32
  }
}

</mosaic_0001>

<bundles_post_ra>
// kernel: concat_fuse_block.1
= control target key start
LH: loop header
LB: loop body
LE: loop exit
PB: predicated region body
PF: predicated region fallthrough
CT: control target
= control target key end

     0   :  { %s765_s23 = smov 0   ;;  %s767_s24 = smov 0   ;;  %s839_s0 = inlined_call_operand.vmem [shape: f32[2,16,256], index: 0, kind: input, shape index: {}]   ;;  %s840_s1 = inlined_call_operand.vmem [shape: f32[2,16,256], index: 1, kind: input, shape index: {}]   ;;  %s841_s2 = inlined_call_operand.vmem [shape: f32[2,16,256], index: 2, kind: input, shape index: {}]   ;;  %s842_s3 = inlined_call_operand.vmem [shape: f32[2,16,256], index: 3, kind: input, shape index: {}]   ;;  %s843_s4 = inlined_call_operand.vmem [shape: f32[64,1], index: 4, kind: input, shape index: {}]   ;;  %s844_s5 = inlined_call_operand.<no memory space> [shape: f32[1], index: 5, kind: input, shape index: {}]   ;;  %s845_s6 = inlined_call_operand.vmem [shape: f32[2,1,256], index: 6, kind: output, shape index: {}]  }
   0x1   :  { %11 = sst [smem:[#allocation2]] %s844_s5  ;;  %s769_s25 = smov 0  }
   0x2 LB: > { %s29_s5 = sadd.s32 1, %s720_s24  ;;  %p658_p0 = scmp.ge.s32.totalorder %s724_s25, 1  ;;  %s724_s25 = sphi %s769_s25, %s17_s25   ;;  %s720_s24 = sphi %s767_s24, %s847_s24   ;;  %s716_s23 = sphi %s765_s23, %s846_s23  }
   0x3   : > { %p31_p1 = scmp.ge.s32.totalorder %s29_s5, 2  ;;  %p285_p2 = scmp.lt.s32.totalorder %s724_s25, 3 }
   0x5   : > { %s849_s5 = smov (%p31_p1, %s29_s5), 0  ;;  %p286_p3 = pnand %p658_p0, %p285_p2 }
   0x6   : > { %p350_p4 = scmp.lt.s32.totalorder (!%p286_p3), %s716_s23, 1  ;;  %s504_s10 = sld [smem:[#allocation2]] (!%p286_p3) }
   0x7   : > { %289 = sbr.rel (%p286_p3) target bundleno = 169 (0xa9), region = 44 }
   0xc   : > { %v400_v0 = vld [vmem:[%s843_s4 + $0x10] sm:$0xff]  ;;  %v398_v1 = vld [vmem:[%s843_s4] sm:$0xff]  ;;  %v726_v2 = vmov 0   ;;  %v401_v4 = vld [vmem:[%s843_s4 + $0x18] sm:$0xff]  ;;  %s851_s23 = smov (!%p350_p4, %s716_s23), 1  ;;  %vm511_vm0 = vcmask 1040384  }
   0xd   : > { %700 = vset.pattern.permute.xlu1 %v726_v2  ;;  %699 = vset.pattern.permute.xlu0 %v726_v2  ;;  %v402_v3 = vld [vmem:[%s843_s4 + $0x20] sm:$0xff]  ;;  %v399_v5 = vld [vmem:[%s843_s4 + $0x8] sm:$0xff]  ;;  %v405_v7 = vld [vmem:[%s843_s4 + $0x38] sm:$0xff]  ;;  %s670_s18 = sshll.u32 %s851_s23, 5  ;;  %s667_s11 = sshll.u32 %s851_s23, 1 }
   0xe   : > { %430 = vperm.xlu1 %700, %v400_v0   ;;  %412 = vperm.xlu0 %699, %v398_v1   ;;  %v403_v6 = vld [vmem:[%s843_s4 + $0x28] sm:$0xff]  ;;  %v404_v8 = vld [vmem:[%s843_s4 + $0x30] sm:$0xff]  ;;  %s367_s21 = scalar_lea.vmem %s840_s1, %s670_s18  ;;  %s357_s27 = scalar_lea.vmem %s839_s0, %s670_s18 }
   0xf   : > { %701 = vset.pattern.permute.xlu2 %v726_v2  ;;  %v424_v12 = vld [vmem:[%s367_s21] sm:$0xff]  ;;  %v425_v13 = vld [vmem:[%s367_s21 + $0x8] sm:$0xff]  ;;  %s377_s30 = scalar_lea.vmem %s841_s2, %s670_s18  ;;  %v426_v16 = vld [vmem:[%s367_s21 + $0x10] sm:$0xff]  ;;  %s387_s9 = scalar_lea.vmem %s842_s3, %s670_s18 }
  0x10   : > { %452 = vperm.xlu2 %701, %v402_v3   ;;  %v406_v14 = vld [vmem:[%s357_s27] sm:$0xff]  ;;  %v407_v15 = vld [vmem:[%s357_s27 + $0x8] sm:$0xff]  ;;  %v427_v17 = vld [vmem:[%s367_s21 + $0x18] sm:$0xff]  ;;  %s396_s14 = scalar_lea.vmem %s845_s6, %s667_s11 }
  0x11   : > { %v408_v18 = vld [vmem:[%s357_s27 + $0x10] sm:$0xff]  ;;  %v409_v19 = vld [vmem:[%s357_s27 + $0x18] sm:$0xff]  ;;  %v446_v20 = vld [vmem:[%s377_s30] sm:$0xff] }
  0x12   : > { %v447_v21 = vld [vmem:[%s377_s30 + $0x8] sm:$0xff]  ;;  %v448_v35 = vld [vmem:[%s377_s30 + $0x10] sm:$0xff]  ;;  %v449_v36 = vld [vmem:[%s377_s30 + $0x18] sm:$0xff] }
  0x13   : > { %v470_v41 = vld [vmem:[%s387_s9 + $0x10] sm:$0xff]  ;;  %v471_v44 = vld [vmem:[%s387_s9 + $0x18] sm:$0xff]  ;;  %v468_v45 = vld [vmem:[%s387_s9] sm:$0xff] }
  0x14   : > { %v469_v46 = vld [vmem:[%s387_s9 + $0x8] sm:$0xff] }
  0x16   : > { %435 = vperm.xlu1 %700, %v401_v4   ;;  %417 = vperm.xlu0 %699, %v399_v5  }
  0x18   : > { %457 = vperm.xlu2 %701, %v403_v6  }
  0x1e   : > { %479 = vperm.xlu1 %700, %v405_v7   ;;  %474 = vperm.xlu0 %699, %v404_v8  }
  0x6a   : > { %v453_v11 = vpop.permute.xlu2 %452 }
  0x6b   : > { %v460_v32 = vmul.f32 %v453_v11, %v446_v20  ;;  %v461_v33 = vmul.f32 %v453_v11, %v447_v21 }
  0x72   : > { %v458_v34 = vpop.permute.xlu2 %457 }
  0x73   : > { %v462_v42 = vmul.f32 %v458_v34, %v448_v35  ;;  %v463_v43 = vmul.f32 %v458_v34, %v449_v36 }
  0x80   : > { %v431_v9 = vpop.permute.xlu1 %430  ;;  %v413_v10 = vpop.permute.xlu0 %412 }
  0x81   : > { %v438_v22 = vmul.f32 %v431_v9, %v424_v12  ;;  %v439_v23 = vmul.f32 %v431_v9, %v425_v13  ;;  %v420_v24 = vmul.f32 %v413_v10, %v406_v14  ;;  %v421_v25 = vmul.f32 %v413_v10, %v407_v15 }
  0x82   : > { %v505_v9 = vstv %s504_s10  ;;  %v514_v10 = vlaneseq }
  0x83   : > { %v442_v37 = vadd.f32 %v438_v22, %v420_v24  ;;  %v443_v38 = vadd.f32 %v439_v23, %v421_v25 }
  0x84   : > { %vm516_vm1 = vcmp.lt.s32.totalorder %v514_v10, 256 }
  0x85   : > { %v464_v51 = vadd.f32 %v460_v32, %v442_v37  ;;  %v465_v52 = vadd.f32 %v461_v33, %v443_v38 }
  0x88   : > { %v436_v26 = vpop.permute.xlu1 %435  ;;  %v418_v27 = vpop.permute.xlu0 %417 }
  0x89   : > { %v440_v28 = vmul.f32 %v436_v26, %v426_v16  ;;  %v441_v29 = vmul.f32 %v436_v26, %v427_v17  ;;  %v422_v30 = vmul.f32 %v418_v27, %v408_v18  ;;  %v423_v31 = vmul.f32 %v418_v27, %v409_v19 }
  0x8b   : > { %v444_v39 = vadd.f32 %v440_v28, %v422_v30  ;;  %v445_v40 = vadd.f32 %v441_v29, %v423_v31 }
  0x8d   : > { %v466_v48 = vadd.f32 %v462_v42, %v444_v39  ;;  %v467_v49 = vadd.f32 %v463_v43, %v445_v40 }
  0x90   : > { %v480_v47 = vpop.permute.xlu1 %479  ;;  %v475_v50 = vpop.permute.xlu0 %474 }
  0x91   : > { %v484_v53 = vmul.f32 %v480_v47, %v470_v41  ;;  %v485_v54 = vmul.f32 %v480_v47, %v471_v44  ;;  %v482_v55 = vmul.f32 %v475_v50, %v468_v45  ;;  %v483_v56 = vmul.f32 %v475_v50, %v469_v46 }
  0x93   : > { %v488_v57 = vadd.f32 %v484_v53, %v466_v48  ;;  %v489_v58 = vadd.f32 %v485_v54, %v467_v49  ;;  %v486_v59 = vadd.f32 %v482_v55, %v464_v51  ;;  %v487_v60 = vadd.f32 %v483_v56, %v465_v52 }
  0x95   : > { %v490_v61 = vadd.f32 %v488_v57, %v486_v59  ;;  %v497_v62 = vadd.f32 %v489_v58, %v487_v60 }
  0x97   : > { %v491_v63 = vrot.slane %v490_v61, 4  ;;  %v498_v0 = vrot.slane %v497_v62, 4 }
  0x99   : > { %v492_v1 = vadd.f32 %v491_v63, %v490_v61  ;;  %v499_v2 = vadd.f32 %v498_v0, %v497_v62 }
  0x9b   : > { %v493_v3 = vrot.slane %v492_v1, 2  ;;  %v500_v4 = vrot.slane %v499_v2, 2 }
  0x9d   : > { %v494_v5 = vadd.f32 %v493_v3, %v492_v1  ;;  %v501_v6 = vadd.f32 %v500_v4, %v499_v2 }
  0x9f   : > { %v495_v7 = vrot.slane %v494_v5, 1  ;;  %v502_v8 = vrot.slane %v501_v6, 1 }
  0xa1   : > { %v496_v11 = vadd.f32 %v495_v7, %v494_v5  ;;  %v503_v12 = vadd.f32 %v502_v8, %v501_v6 }
  0xa3   : > { %v507_v13 = vadd.f32 %v505_v9, %v503_v12  ;;  %v506_v14 = vadd.f32 %v505_v9, %v496_v11 }
  0xa5   : > { %v510_v15 = vrot.slane %v507_v13, 7 }
  0xa7   : > { %v512_v16 = vsel %vm511_vm0, %v506_v14, %v510_v15 }
  0xa8   : > { %518 = vst.msk [vmem:[%s396_s14] sm:$0x3] %vm516_vm1, %v512_v16 }
  0xa9 PF: > { %s17_s25 = sadd.s32 1, %s724_s25   ;;  %s846_s23 = smov %s720_s24 }
  0xaa   : > { %p14_p5 = scmp.ge.s32.totalorder %s17_s25, 4   ;;  %s847_s24 = smov %s849_s5 }
  0xac   :  { %16 = sbr.rel (!%p14_p5) target bundleno = 2 (0x2), region = 83 }

</bundles_post_ra>
